<compile_context>
chip_gen: v7x
topology: tpu7x:2x2x1
jax: 0.10.0
libtpu: 0.0.40
codegen_flags: <defaults>
</compile_context>

<pallas_src>
import jax
import jax.numpy as jnp
from jax.experimental import pallas as pl
from jax.experimental.pallas import tpu as pltpu


def _optimer_weight_kernel(wb_ref, x_ref, o_ref):
    # wb_ref: SMEM (6,) f32 = [w0, w1, w2, w3, w4, bias]
    # x_ref : VMEM (5, TB) f32  — batch on the lane axis
    # o_ref : VMEM (1, TB) f32
    r0 = x_ref[0:1, :]
    r1 = x_ref[1:2, :]
    r2 = x_ref[2:3, :]
    r3 = x_ref[3:4, :]
    r4 = x_ref[4:5, :]

    # numerically-stable softmax over the 5 feature rows (unrolled)
    m = jnp.maximum(jnp.maximum(jnp.maximum(r0, r1), jnp.maximum(r2, r3)), r4)
    e0 = jnp.exp(r0 - m)
    e1 = jnp.exp(r1 - m)
    e2 = jnp.exp(r2 - m)
    e3 = jnp.exp(r3 - m)
    e4 = jnp.exp(r4 - m)
    s = e0 + e1 + e2 + e3 + e4

    # EUP approximate reciprocal + one Newton-Raphson step -> full f32 accuracy
    inv = pl.reciprocal(s, approx=True)
    inv = inv * (2.0 - s * inv)

    # linear(5 -> 1) as a 5-term VPU weighted sum (no MXU), weights from SMEM
    num = (wb_ref[0] * e0 + wb_ref[1] * e1 + wb_ref[2] * e2
           + wb_ref[3] * e3 + wb_ref[4] * e4)
    o_ref[...] = num * inv + wb_ref[5]


def optimer_weight_forward(classified, weight, bias, *, max_tile=8192):
    """classified: (B, 5, 1) f32; weight: (1, 5) f32; bias: (1,) f32 -> (B, 1)."""
    # Layout glue (stays in XLA): squeeze + transpose so batch lands on lanes.
    # TODO(synk): if the upstream producer can emit (5, B) directly, drop this copy.
    x_t = jnp.squeeze(classified, axis=-1).T.astype(jnp.float32)   # (5, B)
    F, B = x_t.shape

    # Batch tile: multiple of 128 lanes, capped so double-buffered tiles stay
    # tiny even on v7x's smaller VMEM (20*TB bytes per input tile).
    tb = min(max_tile, 128 * pl.cdiv(B, 128))
    b_pad = tb * pl.cdiv(B, tb)
    if b_pad != B:
        x_t = jnp.pad(x_t, ((0, 0), (0, b_pad - B)))

    # 6 scalars [w0..w4, b] in SMEM — no padded VMEM weight tile, no MXU.
    wb = jnp.concatenate(
        [weight.reshape(-1), bias.reshape(-1)]).astype(jnp.float32)  # (6,)

    out = pl.pallas_call(
        _optimer_weight_kernel,
        out_shape=jax.ShapeDtypeStruct((1, b_pad), jnp.float32),
        grid=(b_pad // tb,),
        in_specs=[
            pl.BlockSpec(memory_space=pltpu.MemorySpace.SMEM),   # wb (whole, SMEM)
            pl.BlockSpec((F, tb), lambda i: (0, i)),             # (5, TB) activation tile
        ],
        out_specs=pl.BlockSpec((1, tb), lambda i: (0, i)),       # lane-dense output
        compiler_params=pltpu.CompilerParams(
            dimension_semantics=("parallel",)),
    )(wb, x_t)

    return out[0, :B].reshape(B, 1)


def _reference(classified, weight, bias):
    x = jnp.squeeze(classified, axis=-1)
    p = jax.nn.softmax(x, axis=-1)
    return p @ weight.T + bias


if __name__ == "__main__":
    key = jax.random.PRNGKey(0)
    k_x, k_w, k_b, k_x2 = jax.random.split(key, 4)

    # Deterministic synthetic parameters for nn.Linear(5, 1)
    bound = 1.0 / jnp.sqrt(5.0)
    weight = jax.random.uniform(k_w, (1, 5), jnp.float32, -bound, bound)
    bias = jax.random.uniform(k_b, (1,), jnp.float32, -bound, bound)

    # Unused buffer from the original module (kept for fidelity; not used in forward).
    conv1 = jnp.array([[-2.8, -1.5, -0.8, 1.0, 2.5]], dtype=jnp.float32)

    # Primary small-shape run.
    B = 8
    classified = jax.random.normal(k_x, (B, 5, 1), dtype=jnp.float32)
    out = optimer_weight_forward(classified, weight, bias)
    out = jax.block_until_ready(out)
    ref = _reference(classified, weight, bias)
    assert out.shape == (B, 1), out.shape
    assert jnp.allclose(out, ref, atol=1e-5, rtol=1e-5), (out, ref)

    # Extra check: batch not a multiple of the tile width (exercises grid + padding).
    B2 = 300
    classified2 = jax.random.normal(k_x2, (B2, 5, 1), dtype=jnp.float32)
    out2 = jax.block_until_ready(optimer_weight_forward(classified2, weight, bias))
    ref2 = _reference(classified2, weight, bias)
    assert out2.shape == (B2, 1), out2.shape
    assert jnp.allclose(out2, ref2, atol=1e-5, rtol=1e-5), (out2, ref2)

    print("KERNEL_OK")
</pallas_src>

<mosaic_0001>
module attributes {stable_mosaic.version = 11 : i64} {
  func.func @_optimer_weight_kernel(%arg0: i32, %arg1: memref<6xf32, #tpu.memory_space<smem>>, %arg2: memref<5x128xf32, #tpu.memory_space<vmem>>, %arg3: memref<1x128xf32, #tpu.memory_space<vmem>>) attributes {dimension_semantics = [#tpu.dimension_semantics<parallel>], iteration_bounds = array<i64: 1>, scalar_prefetch = 0 : i64, scratch_operands = 0 : i64, tpu.core_type = #tpu.core_type<tc>, window_params = [{transform_indices = @transform_0, window_bounds = array<i64: 6>}, {transform_indices = @transform_1, window_bounds = array<i64: 5, 128>}, {transform_indices = @transform_2, window_bounds = array<i64: 1, 128>}]} {
    %c0 = arith.constant 0 : index
    %c0_0 = arith.constant 0 : index
    %0 = vector.load %arg2[%c0, %c0_0] : memref<5x128xf32, #tpu.memory_space<vmem>>, vector<1x128xf32>
    %c1 = arith.constant 1 : index
    %c0_1 = arith.constant 0 : index
    %1 = vector.load %arg2[%c1, %c0_1] : memref<5x128xf32, #tpu.memory_space<vmem>>, vector<1x128xf32>
    %c2 = arith.constant 2 : index
    %c0_2 = arith.constant 0 : index
    %2 = vector.load %arg2[%c2, %c0_2] : memref<5x128xf32, #tpu.memory_space<vmem>>, vector<1x128xf32>
    %c3 = arith.constant 3 : index
    %c0_3 = arith.constant 0 : index
    %3 = vector.load %arg2[%c3, %c0_3] : memref<5x128xf32, #tpu.memory_space<vmem>>, vector<1x128xf32>
    %c4 = arith.constant 4 : index
    %c0_4 = arith.constant 0 : index
    %4 = vector.load %arg2[%c4, %c0_4] : memref<5x128xf32, #tpu.memory_space<vmem>>, vector<1x128xf32>
    %5 = arith.maximumf %0, %1 : vector<1x128xf32>
    %6 = arith.maximumf %2, %3 : vector<1x128xf32>
    %7 = arith.maximumf %5, %6 : vector<1x128xf32>
    %8 = arith.maximumf %7, %4 : vector<1x128xf32>
    %9 = arith.subf %0, %8 : vector<1x128xf32>
    %10 = math.exp %9 : vector<1x128xf32>
    %11 = arith.subf %1, %8 : vector<1x128xf32>
    %12 = math.exp %11 : vector<1x128xf32>
    %13 = arith.subf %2, %8 : vector<1x128xf32>
    %14 = math.exp %13 : vector<1x128xf32>
    %15 = arith.subf %3, %8 : vector<1x128xf32>
    %16 = math.exp %15 : vector<1x128xf32>
    %17 = arith.subf %4, %8 : vector<1x128xf32>
    %18 = math.exp %17 : vector<1x128xf32>
    %19 = arith.addf %10, %12 : vector<1x128xf32>
    %20 = arith.addf %19, %14 : vector<1x128xf32>
    %21 = arith.addf %20, %16 : vector<1x128xf32>
    %22 = arith.addf %21, %18 : vector<1x128xf32>
    %23 = tpu.reciprocal %22 {approx = true} : vector<1x128xf32> -> vector<1x128xf32>
    %24 = arith.mulf %22, %23 : vector<1x128xf32>
    %cst = arith.constant 2.000000e+00 : f32
    %25 = vector.broadcast %cst : f32 to vector<1x128xf32>
    %26 = arith.subf %25, %24 : vector<1x128xf32>
    %27 = arith.mulf %23, %26 : vector<1x128xf32>
    %c0_5 = arith.constant 0 : index
    %28 = memref.load %arg1[%c0_5] : memref<6xf32, #tpu.memory_space<smem>>
    %29 = vector.broadcast %28 : f32 to vector<1x128xf32>
    %30 = arith.mulf %29, %10 : vector<1x128xf32>
    %c1_6 = arith.constant 1 : index
    %31 = memref.load %arg1[%c1_6] : memref<6xf32, #tpu.memory_space<smem>>
    %32 = vector.broadcast %31 : f32 to vector<1x128xf32>
    %33 = arith.mulf %32, %12 : vector<1x128xf32>
    %34 = arith.addf %30, %33 : vector<1x128xf32>
    %c2_7 = arith.constant 2 : index
    %35 = memref.load %arg1[%c2_7] : memref<6xf32, #tpu.memory_space<smem>>
    %36 = vector.broadcast %35 : f32 to vector<1x128xf32>
    %37 = arith.mulf %36, %14 : vector<1x128xf32>
    %38 = arith.addf %34, %37 : vector<1x128xf32>
    %c3_8 = arith.constant 3 : index
    %39 = memref.load %arg1[%c3_8] : memref<6xf32, #tpu.memory_space<smem>>
    %40 = vector.broadcast %39 : f32 to vector<1x128xf32>
    %41 = arith.mulf %40, %16 : vector<1x128xf32>
    %42 = arith.addf %38, %41 : vector<1x128xf32>
    %c4_9 = arith.constant 4 : index
    %43 = memref.load %arg1[%c4_9] : memref<6xf32, #tpu.memory_space<smem>>
    %44 = vector.broadcast %43 : f32 to vector<1x128xf32>
    %45 = arith.mulf %44, %18 : vector<1x128xf32>
    %46 = arith.addf %42, %45 : vector<1x128xf32>
    %47 = arith.mulf %46, %27 : vector<1x128xf32>
    %c5 = arith.constant 5 : index
    %48 = memref.load %arg1[%c5] : memref<6xf32, #tpu.memory_space<smem>>
    %49 = vector.broadcast %48 : f32 to vector<1x128xf32>
    %50 = arith.addf %47, %49 : vector<1x128xf32>
    %c0_10 = arith.constant 0 : index
    %c0_11 = arith.constant 0 : index
    %51 = vector.load %arg3[%c0_10, %c0_11] : memref<1x128xf32, #tpu.memory_space<vmem>>, vector<1x128xf32>
    tpu.vector_store %arg3[%c0_10, %c0_11], %50 {strides = array<i32>} : memref<1x128xf32, #tpu.memory_space<vmem>>, vector<1x128xf32>,
    return
  }
  func.func @transform_0(%arg0: i32) -> i32 {
    %c0_i32 = arith.constant 0 : i32
    %c0_i32_0 = arith.constant 0 : i32
    return %c0_i32 : i32
  }
  func.func @transform_1(%arg0: i32) -> (i32, i32) {
    %c0_i32 = arith.constant 0 : i32
    %c0_i32_0 = arith.constant 0 : i32
    return %c0_i32, %arg0 : i32, i32
  }
  func.func @transform_2(%arg0: i32) -> (i32, i32) {
    %c0_i32 = arith.constant 0 : i32
    %c0_i32_0 = arith.constant 0 : i32
    return %c0_i32, %arg0 : i32, i32
  }
}

</mosaic_0001>

<bundles_post_ra>
// kernel: tpu_custom_call.1
= control target key start
LH: loop header
LB: loop body
LE: loop exit
PB: predicated region body
PF: predicated region fallthrough
CT: control target
= control target key end

     0   :  { %7 = vsyncpa [#allocation5], 0  ;;  %s241_s0 = inlined_call_operand.hbm [shape: f32[6], index: 0, kind: input, shape index: {}]   ;;  %s242_s1 = inlined_call_operand.hbm [shape: f32[5,128], index: 1, kind: input, shape index: {}]   ;;  %s243_s2 = inlined_call_operand.hbm [shape: f32[1,128], index: 2, kind: output, shape index: {}]  }
   0x1   :  { %8 = vsyncpa [#allocation3], 0 }
   0x2   :  { %9 = vsyncpa [#allocation4], 0  ;;  %s127_s11 = scalar_lea.hbm %s241_s0, 16 }
   0x3   :  { %p128_p0 = scmp.ne.s32.totalorder %s241_s0, %s127_s11  ;;  %p131_p1 = scmp.lt.u32.totalorder %s127_s11, %s241_s0 }
   0x5   :  { %p133_p2 = pnand %p131_p1, %p128_p0 }
   0x7   :  { %136 = shalt.err (!%p133_p2)
}
   0x8   :  { %s187_s16 = smov [#allocation2]   ;;  %s188_s19 = smov [#allocation6]  }
   0x9   :  { %17 = dma.hbm_to_smem %s241_s0, 16, %s187_s16, [#allocation5]  }
   0xa   :  { %s24_s20 = sshll.u32 %s188_s19, 4  ;;  %s137_s23 = scalar_lea.hbm %s242_s1, 128  ;;  %s25_s20 = int_to_ptr.vmem [resolvable:$true] %s24_s20 }
   0xb   :  { %p138_p3 = scmp.ne.s32.totalorder %s242_s1, %s137_s23  ;;  %p141_p4 = scmp.lt.u32.totalorder %s137_s23, %s242_s1 }
   0xd   :  { %p143_p5 = pnand %p141_p4, %p138_p3 }
   0xf   :  { %146 = shalt.err (!%p143_p5)
}
  0x10   :  { %s147_s28 = scalar_lea.vmem %s25_s20, 128  ;;  %p152_p7 = scmp.lt.s32.totalorder %s25_s20, %s25_s20 }
  0x11   :  { %p148_p6 = scmp.ne.s32.totalorder %s25_s20, %s147_s28  ;;  %p153_p8 = scmp.lt.s32.totalorder %s147_s28, %s147_s28 }
  0x13   :  { %p154_p9 = por %p153_p8, %p152_p7 }
  0x15   :  { %p155_p10 = pnand %p154_p9, %p148_p6 }
  0x17   :  { %158 = shalt.err (!%p155_p10)
}
  0x18   :  { %27 = dma.hbm_to_vmem [thread:$0]  %s242_s1, 128, %s25_s20, [#allocation3]  }
  0x19   :  { %181 = dma.done.wait [#allocation5], 16  }
  0x1a   :  { %182 = vsyncadd [#allocation5], 4294967280 }
  0x1b   :  { %183 = dma.done.wait [#allocation3], 128  }
  0x1c   :  { %184 = vsyncadd [#allocation3], 4294967168 }
  0x1d   :  { %34 = sfence }
  0x1e   :  { %v35_v0 = vld [vmem:[#allocation6] sm:$0x1]  ;;  %v36_v1 = vld [vmem:[#allocation6 + $0x1] sm:$0x1]  ;;  %v37_v2 = vld [vmem:[#allocation6 + $0x2] sm:$0x1] }
  0x1f   :  { %v38_v3 = vld [vmem:[#allocation6 + $0x3] sm:$0x1]  ;;  %v40_v4 = vmax.f32 %v35_v0, %v36_v1  ;;  %v39_v6 = vld [vmem:[#allocation6 + $0x4] sm:$0x1]  ;;  %s67_s1 = sld [smem:[#allocation2]]  ;;  %s107_s30 = sld [smem:[#allocation2 + $0x1]] }
  0x20   :  { %v41_v5 = vmax.f32 %v37_v2, %v38_v3  ;;  %s108_s3 = sld [smem:[#allocation2 + $0x2]]  ;;  %s109_s4 = sld [smem:[#allocation2 + $0x3]] }
  0x21   :  { %s110_s5 = sld [smem:[#allocation2 + $0x4]]  ;;  %s111_s6 = sld [smem:[#allocation2 + $0x5]] }
  0x22   :  { %v42_v7 = vmax.f32 %v40_v4, %v41_v5  ;;  %s189_s7 = smov [#allocation7]  }
  0x23   :  { %s97_s8 = sshll.u32 %s189_s7, 4  ;;  %s98_s8 = int_to_ptr.vmem [resolvable:$true] %s97_s8 }
  0x24   :  { %v43_v8 = vmax.f32 %v42_v7, %v39_v6  ;;  %s159_s9 = scalar_lea.vmem %s98_s8, 16  ;;  %s163_s10 = scalar_lea.vmem %s98_s8, 32 }
  0x25   :  { %v68_v25 = vstv %s67_s1  ;;  %v71_v26 = vstv %s107_s30  ;;  %p160_p11 = scmp.ne.s32.totalorder %s98_s8, %s159_s9  ;;  %p164_p12 = scmp.lt.s32.totalorder %s98_s8, %s98_s8 }
  0x26   :  { %v44_v9 = vsub.f32 %v35_v0, %v43_v8  ;;  %v47_v10 = vsub.f32 %v36_v1, %v43_v8  ;;  %v50_v11 = vsub.f32 %v37_v2, %v43_v8  ;;  %v53_v12 = vsub.f32 %v38_v3, %v43_v8  ;;  %p165_p13 = scmp.lt.s32.totalorder %s163_s10, %s159_s9 }
  0x27   :  { %v56_v13 = vsub.f32 %v39_v6, %v43_v8  ;;  %v75_v32 = vstv %s108_s3  ;;  %v79_v35 = vstv %s109_s4  ;;  %v83_v38 = vstv %s110_s5 }
  0x28   :  { %v45_v14 = vmul.f32 1.442695, %v44_v9  ;;  %v48_v15 = vmul.f32 1.442695, %v47_v10  ;;  %v51_v16 = vmul.f32 1.442695, %v50_v11  ;;  %v88_v46 = vstv %s111_s6  ;;  %p166_p0 = por %p165_p13, %p164_p12 }
  0x29   :  { %v54_v17 = vmul.f32 1.442695, %v53_v12  ;;  %v57_v18 = vmul.f32 1.442695, %v56_v13 }
  0x2a   :  { %115 = vpow2.f32 %v45_v14  ;;  %p167_p1 = pnand %p166_p0, %p160_p11 }
  0x2b   :  { %117 = vpow2.f32 %v48_v15 }
  0x2c   :  { %119 = vpow2.f32 %v51_v16 }
  0x2d   :  { %121 = vpow2.f32 %v54_v17 }
  0x2e   :  { %123 = vpow2.f32 %v57_v18 }
  0x34   :  { %v116_v19 = vpop.eup %115 }
  0x35   :  { %v118_v20 = vpop.eup %117  ;;  %v69_v29 = vmul.f32 %v116_v19, %v68_v25 }
  0x36   :  { %v120_v21 = vpop.eup %119  ;;  %v59_v22 = vadd.f32 %v118_v20, %v116_v19  ;;  %v72_v30 = vmul.f32 %v118_v20, %v71_v26 }
  0x37   :  { %v122_v23 = vpop.eup %121  ;;  %v76_v34 = vmul.f32 %v120_v21, %v75_v32 }
  0x38   :  { %v60_v24 = vadd.f32 %v120_v21, %v59_v22  ;;  %v124_v27 = vpop.eup %123  ;;  %v73_v33 = vadd.f32 %v72_v30, %v69_v29  ;;  %v80_v37 = vmul.f32 %v122_v23, %v79_v35 }
  0x39   :  { %v84_v40 = vmul.f32 %v124_v27, %v83_v38 }
  0x3a   :  { %v61_v28 = vadd.f32 %v122_v23, %v60_v24  ;;  %v77_v36 = vadd.f32 %v76_v34, %v73_v33 }
  0x3c   :  { %v62_v31 = vadd.f32 %v124_v27, %v61_v28  ;;  %v81_v39 = vadd.f32 %v80_v37, %v77_v36 }
  0x3e   :  { %125 = vrcp.f32 %v62_v31  ;;  %v85_v44 = vadd.f32 %v84_v40, %v81_v39 }
  0x48   :  { %v126_v41 = vpop.eup %125 }
  0x49   :  { %v64_v42 = vmul.f32 %v126_v41, %v62_v31 }
  0x4b   :  { %v65_v43 = vsub.f32 2.0, %v64_v42 }
  0x4d   :  { %v66_v45 = vmul.f32 %v126_v41, %v65_v43 }
  0x4f   :  { %v86_v47 = vmul.f32 %v85_v44, %v66_v45 }
  0x51   :  { %v89_v48 = vadd.f32 %v88_v46, %v86_v47 }
  0x53   :  { %90 = vst [vmem:[#allocation7] sm:$0x1] %v89_v48 }
  0x54   :  { %170 = shalt.err (!%p167_p1)
}
  0x55   :  { %s171_s13 = scalar_lea.hbm %s243_s2, 16 }
  0x56   :  { %p172_p2 = scmp.ne.s32.totalorder %s243_s2, %s171_s13  ;;  %p175_p3 = scmp.lt.u32.totalorder %s171_s13, %s243_s2 }
  0x58   :  { %p177_p4 = pnand %p175_p3, %p172_p2 }
  0x5a   :  { %180 = shalt.err (!%p177_p4)
}
  0x5b   :  { %100 = dma.vmem_to_hbm [thread:$0]  %s98_s8, 16, %s243_s2, [#allocation4]  }
  0x5c   :  { %185 = dma.done.wait [#allocation4], 16  }
  0x5d   :  { %186 = vsyncadd [#allocation4], 4294967280 }
  0x5e   :  { %104 = vsyncpa [#allocation3], 1 }
  0x5f   :  { %105 = vsyncpa [#allocation4], 1 }
  0x60   :  { %106 = vsyncpa [#allocation5], 1 }

</bundles_post_ra>
